<compile_context>
chip_gen: v6e
topology: v6e:2x2x1
jax: 0.10.0
libtpu: 0.0.40
codegen_flags: <defaults>
</compile_context>

<pallas_src>
import functools
import math

import jax
import jax.numpy as jnp
from jax import lax
from jax.experimental import pallas as pl
from jax.experimental.pallas import tpu as pltpu


def _round_up(x, m):
    return ((x + m - 1) // m) * m


def _pick_batch_tile(batch, max_tile=8):
    """Batch tile: full batch when it fits in one grid step, else a multiple of
    8 (the (8,128) constraint applies to the (Bt, nf_p) style block)."""
    if batch <= max_tile:
        return batch
    return max(8, (max_tile // 8) * 8)


def _maybe_vmem_limit(vmem_est_bytes):
    """Raise the scoped-VMEM limit only when the estimate needs it, capped at
    ~45% of physical VMEM (chip-aware: v7x only has 64 MiB)."""
    if vmem_est_bytes <= 12 * 1024 * 1024:
        return None
    try:
        cap = pltpu.get_tpu_info().vmem_capacity_bytes
    except Exception:                      # pragma: no cover - conservative
        cap = 64 * 1024 * 1024
    return int(min(2 * vmem_est_bytes, int(0.45 * cap)))


# ---------------------------------------------------------------------------
# Kernel 1: fused gram_matrix + Destyler (5 Linear layers), batch-tiled.
#   gram per image:  G = F @ F^T / (H*W)   (bf16 operands, f32 accumulate)
#   layer 1:         h = vec(G) @ W0  done as sum_c G[c,:] @ W0[c]  (no reshape)
#   layers 2..5:     batched (Bt, nf_p) @ (nf_p, nf_p) matmuls
# Feature dims are zero-padded to nf_p (multiple of 128): exact and lane-dense.
# ---------------------------------------------------------------------------
def _gram_destyler_kernel(x_ref,
                          w0_ref, b0_ref, w1_ref, b1_ref, w2_ref, b2_ref,
                          w3_ref, b3_ref, w4_ref, b4_ref,
                          o_ref, *, inv_hw, bt, c, nf_p, compute_dtype):
    rows = []
    for k in range(bt):
        f = x_ref[k].astype(compute_dtype)                       # (C, Sp)
        g = lax.dot_general(f, f, (((1,), (1,)), ((), ())),
                            preferred_element_type=jnp.float32) * inv_hw
        h = jnp.zeros((1, nf_p), jnp.float32)
        for ci in range(c):                                       # first layer
            h = h + jnp.dot(g[ci:ci + 1, :].astype(compute_dtype), w0_ref[ci],
                            preferred_element_type=jnp.float32)
        rows.append(h)
    h = jnp.concatenate(rows, axis=0) + b0_ref[...]               # (Bt, nf_p)
    for w_ref, b_ref in ((w1_ref, b1_ref), (w2_ref, b2_ref),
                         (w3_ref, b3_ref), (w4_ref, b4_ref)):
        h = jnp.dot(h.astype(compute_dtype), w_ref[...],
                    preferred_element_type=jnp.float32) + b_ref[...]
    o_ref[...] = h


# ---------------------------------------------------------------------------
# Kernel 2: fused conv1 + LeakyReLU + conv2 + AdaIN + residual + LeakyReLU.
#
# Input x is passed once as a flattened, spatially-padded slab (B, C, Sp)
# (Sp = padded H*W rounded up to 128 lanes).  Each conv is kh*kw accumulating
# matmuls W_tap (Cout,Cin) @ x_flat[:, off_t : off_t + N] (a pure lane-offset
# slice -> in-kernel "im2col" with no HBM blowup).  Valid output positions sit
# at flat index i*Wp + j; `mask` zeroes everything else so conv2 sees exact
# zero padding and the AdaIN statistics only cover the H*W valid pixels.
# ---------------------------------------------------------------------------
def _conv_block_kernel(x_ref, w1_ref, b1_ref, w2_ref, b2_ref,
                       gam_ref, bet_ref, mask_ref,
                       o_ref, x1p_ref, *, tap_offsets, shift, n_out, inv_hw,
                       eps, negative_slope, bt, compute_dtype):
    mask = mask_ref[...]                                          # (1, N)
    for k in range(bt):
        xk = x_ref[k]                                             # (Cin, Sp) f32
        xk_c = xk.astype(compute_dtype)

        # conv1: shifted-slice matmuls, f32 accumulate, + bias + LeakyReLU.
        acc1 = None
        for t, off in enumerate(tap_offsets):
            p = jnp.dot(w1_ref[t], xk_c[:, off:off + n_out],
                        preferred_element_type=jnp.float32)
            acc1 = p if acc1 is None else acc1 + p
        out1 = acc1 + b1_ref[...]
        out1 = jnp.where(out1 >= 0, out1, negative_slope * out1)

        # Build conv2's zero-padded input in VMEM: mask invalid columns and
        # shift by (pad, pad) -> flat offset `shift`.
        x1p_ref[...] = jnp.zeros_like(x1p_ref)
        x1p_ref[:, shift:shift + n_out] = out1 * mask
        x1p = x1p_ref[...].astype(compute_dtype)

        # conv2
        acc2 = None
        for t, off in enumerate(tap_offsets):
            p = jnp.dot(w2_ref[t], x1p[:, off:off + n_out],
                        preferred_element_type=jnp.float32)
            acc2 = p if acc2 is None else acc2 + p
        out2 = acc2 + b2_ref[...]

        # AdaIN (instance norm + style affine) over the H*W valid positions.
        mu = jnp.sum(out2 * mask, axis=-1, keepdims=True) * inv_hw
        diff = out2 - mu
        var = jnp.sum(diff * diff * mask, axis=-1, keepdims=True) * inv_hw
        y = diff * lax.rsqrt(var + eps) * gam_ref[k] + bet_ref[k]

        # Residual (original x sits at flat offset `shift`) + LeakyReLU.
        out = y + xk[:, shift:shift + n_out]
        o_ref[k] = jnp.where(out >= 0, out, negative_slope * out)


# ---------------------------------------------------------------------------
# Full block forward (default config: no projection / attention / dropout)
# ---------------------------------------------------------------------------
def destyle_gram_res_block(x, params, *, negative_slope=0.2, eps=1e-5,
                           compute_dtype=jnp.bfloat16, batch_tile=8):
    B, C, H, W = x.shape
    w1, b1 = params["w1"], params["b1"]
    w2, b2 = params["w2"], params["b2"]
    pad, dil = params["padding"], params["dilation"]
    Cout, Cin, kh, kw = w1.shape
    assert Cin == C and Cout == C, "default config: channels_in == channels_out"
    # TODO(synk): stride != 1 / 1x1 projection / ChannelAttention /
    # SpatialAttention / dropout branches are disabled at the module defaults
    # and are not implemented here.
    Hp, Wp = H + 2 * pad, W + 2 * pad
    assert Hp - dil * (kh - 1) == H and Wp - dil * (kw - 1) == W, (
        "residual add requires a 'same' convolution (stride 1, pad=dil*(k-1)/2)")

    bt = _pick_batch_tile(B, batch_tile)       # NOTE: no 2-TC grid split; the
    B_pad = _round_up(B, bt)                   # old halving broke 8-alignment
    grid = (B_pad // bt,)                      # and pessimizes 1-TC chips.

    # One flattened, spatially padded, lane-dense slab of x shared by both
    # kernels (zero padding: gram over it is exact, conv border reads zeros).
    S = Hp * Wp
    off_max = dil * (kh - 1) * Wp + dil * (kw - 1)
    n_out = _round_up(H * Wp, 128)             # lane-dense output width
    Sp = _round_up(max(S, n_out + off_max), 128)
    shift = pad * Wp + pad

    xp = jnp.pad(x.astype(jnp.float32),
                 ((0, B_pad - B), (0, 0), (pad, pad), (pad, pad)))
    x_flat = jnp.pad(xp.reshape(B_pad, C, S), ((0, 0), (0, 0), (0, Sp - S)))

    # ------------------------- gram + destyler ----------------------------
    nf = 2 * C
    nf_p = _round_up(nf, 128)
    in_f = C * C
    dst_w, dst_b = params["dst_w"], params["dst_b"]

    w0_p = jnp.zeros((in_f, nf_p), compute_dtype).at[:, :nf].set(
        dst_w[0].astype(compute_dtype)).reshape(C, C, nf_p)
    flat_params = [w0_p,
                   jnp.zeros((1, nf_p), jnp.float32).at[:, :nf].set(
                       dst_b[0].astype(jnp.float32))]
    for w, b in zip(dst_w[1:], dst_b[1:]):
        flat_params.append(jnp.zeros((nf_p, nf_p), compute_dtype)
                           .at[:nf, :nf].set(w.astype(compute_dtype)))
        flat_params.append(jnp.zeros((1, nf_p), jnp.float32)
                           .at[:, :nf].set(b.astype(jnp.float32)))

    dst_in_specs = [pl.BlockSpec((bt, C, Sp), lambda i: (i, 0, 0)),
                    pl.BlockSpec((C, C, nf_p), lambda i: (0, 0, 0)),
                    pl.BlockSpec((1, nf_p), lambda i: (0, 0))]
    for _ in range(4):
        dst_in_specs.append(pl.BlockSpec((nf_p, nf_p), lambda i: (0, 0)))
        dst_in_specs.append(pl.BlockSpec((1, nf_p), lambda i: (0, 0)))
    # TODO(synk): mark the constant-index weight/bias specs with
    # pipeline_mode=pl.Buffered(1) to single-buffer grid-invariant operands
    # once num_features is large enough for their VMEM footprint to matter.

    param_bytes = sum(int(a.size) * a.dtype.itemsize for a in flat_params)
    dst_flops = 2 * B_pad * (C * C * Sp + in_f * nf_p + 4 * nf_p * nf_p)
    dst_bytes = int(x_flat.size) * 4 + param_bytes + B_pad * nf_p * 4
    dst_vmem = 2 * (bt * C * Sp * 4 + bt * nf_p * 4) + 2 * param_bytes

    style_pad = pl.pallas_call(
        functools.partial(_gram_destyler_kernel, inv_hw=1.0 / (H * W),
                          bt=bt, c=C, nf_p=nf_p, compute_dtype=compute_dtype),
        out_shape=jax.ShapeDtypeStruct((B_pad, nf_p), jnp.float32),
        grid=grid,
        in_specs=dst_in_specs,
        out_specs=pl.BlockSpec((bt, nf_p), lambda i: (i, 0)),
        compiler_params=pltpu.CompilerParams(
            dimension_semantics=("parallel",),
            vmem_limit_bytes=_maybe_vmem_limit(dst_vmem)),
        cost_estimate=pl.CostEstimate(flops=dst_flops, transcendentals=0,
                                      bytes_accessed=dst_bytes),
    )(x_flat, *flat_params)

    # TODO(synk): AdaIN is not defined in the source file; assuming the
    # standard form (per-channel instance norm, gamma/beta = halves of style).
    gamma = style_pad[:, :C].reshape(B_pad, C, 1)
    beta = style_pad[:, C:2 * C].reshape(B_pad, C, 1)

    # ------------- fused conv1 + lrelu + conv2 + AdaIN + res + lrelu --------
    w1_t = jnp.transpose(w1, (2, 3, 0, 1)).reshape(kh * kw, Cout, Cin) \
        .astype(compute_dtype)
    w2_t = jnp.transpose(w2, (2, 3, 0, 1)).reshape(kh * kw, Cout, Cin) \
        .astype(compute_dtype)
    b1_c = b1.reshape(Cout, 1).astype(jnp.float32)
    b2_c = b2.reshape(Cout, 1).astype(jnp.float32)

    q = jnp.arange(n_out)
    mask = (((q // Wp) < H) & ((q % Wp) < W)).astype(jnp.float32) \
        .reshape(1, n_out)

    tap_offsets = tuple(di * dil * Wp + dj * dil
                        for di in range(kh) for dj in range(kw))

    conv_flops = 4 * B_pad * kh * kw * Cout * Cin * n_out
    conv_bytes = int(x_flat.size) * 4 + B_pad * Cout * n_out * 4
    conv_vmem = (2 * (bt * C * Sp * 4 + bt * Cout * n_out * 4)
                 + Cout * Sp * 4 + 4 * kh * kw * Cout * Cin)

    out_full = pl.pallas_call(
        functools.partial(_conv_block_kernel, tap_offsets=tap_offsets,
                          shift=shift, n_out=n_out, inv_hw=1.0 / (H * W),
                          eps=eps, negative_slope=negative_slope, bt=bt,
                          compute_dtype=compute_dtype),
        out_shape=jax.ShapeDtypeStruct((B_pad, Cout, n_out), jnp.float32),
        grid=grid,
        in_specs=[pl.BlockSpec((bt, C, Sp), lambda i: (i, 0, 0)),
                  pl.BlockSpec((kh * kw, Cout, Cin), lambda i: (0, 0, 0)),
                  pl.BlockSpec((Cout, 1), lambda i: (0, 0)),
                  pl.BlockSpec((kh * kw, Cout, Cin), lambda i: (0, 0, 0)),
                  pl.BlockSpec((Cout, 1), lambda i: (0, 0)),
                  pl.BlockSpec((bt, Cout, 1), lambda i: (i, 0, 0)),
                  pl.BlockSpec((bt, Cout, 1), lambda i: (i, 0, 0)),
                  pl.BlockSpec((1, n_out), lambda i: (0, 0))],
        out_specs=pl.BlockSpec((bt, Cout, n_out), lambda i: (i, 0, 0)),
        scratch_shapes=[pltpu.VMEM((Cout, Sp), jnp.float32)],
        compiler_params=pltpu.CompilerParams(
            dimension_semantics=("parallel",),
            vmem_limit_bytes=_maybe_vmem_limit(conv_vmem)),
        cost_estimate=pl.CostEstimate(flops=conv_flops,
                                      transcendentals=B_pad * Cout,
                                      bytes_accessed=conv_bytes),
    )(x_flat, w1_t, b1_c, w2_t, b2_c, gamma, beta, mask)

    # Valid outputs live at flat index i*Wp + j; extract in the wrapper.
    out = out_full[:B, :, :H * Wp].reshape(B, Cout, H, Wp)[:, :, :, :W]
    return out


# ---------------------------------------------------------------------------
# Deterministic params + pure-JAX reference (same bf16-operand/f32-accumulate
# matmul contract as the kernels).
# ---------------------------------------------------------------------------
def init_params(key, channels, kernel_size=3, padding=1, dilation=1):
    C = channels

    def uniform(k, shape, fan_in):
        bound = 1.0 / math.sqrt(fan_in)
        return jax.random.uniform(k, shape, jnp.float32, -bound, bound)

    keys = jax.random.split(key, 16)
    fan_conv = C * kernel_size * kernel_size
    params = {"padding": padding, "dilation": dilation,
              "w1": uniform(keys[0], (C, C, kernel_size, kernel_size), fan_conv),
              "b1": uniform(keys[1], (C,), fan_conv),
              "w2": uniform(keys[2], (C, C, kernel_size, kernel_size), fan_conv),
              "b2": uniform(keys[3], (C,), fan_conv)}
    dims = [(C * C, 2 * C)] + [(2 * C, 2 * C)] * 4
    dw, db = [], []
    for i, (d_in, d_out) in enumerate(dims):
        dw.append(uniform(keys[4 + 2 * i], (d_in, d_out), d_in))
        db.append(uniform(keys[5 + 2 * i], (1, d_out), d_in))
    params["dst_w"], params["dst_b"] = dw, db
    return params


def reference_block(x, params, *, negative_slope=0.2, eps=1e-5,
                    compute_dtype=jnp.bfloat16):
    B, C, H, W = x.shape
    cd = compute_dtype
    f = x.reshape(B, C, H * W).astype(cd)
    g = (jnp.einsum("bcs,bds->bcd", f, f,
                    preferred_element_type=jnp.float32) / (H * W)
         ).reshape(B, C * C)

    h = g
    for wgt, bia in zip(params["dst_w"], params["dst_b"]):
        h = jnp.dot(h.astype(cd), wgt.astype(cd),
                    preferred_element_type=jnp.float32) + bia
    style = h

    def conv(z, w, b):
        y = lax.conv_general_dilated(
            z.astype(cd), w.astype(cd), window_strides=(1, 1),
            padding=[(params["padding"],) * 2, (params["padding"],) * 2],
            rhs_dilation=(params["dilation"],) * 2,
            dimension_numbers=("NCHW", "OIHW", "NCHW"),
            preferred_element_type=jnp.float32)
        return y + b.reshape(1, -1, 1, 1)

    out = conv(x, params["w1"], params["b1"])
    out = jnp.where(out >= 0, out, negative_slope * out)
    out = conv(out, params["w2"], params["b2"])

    gamma = style[:, :C].reshape(B, C, 1, 1)
    beta = style[:, C:2 * C].reshape(B, C, 1, 1)
    mu = out.mean(axis=(2, 3), keepdims=True)
    var = ((out - mu) ** 2).mean(axis=(2, 3), keepdims=True)
    out = (out - mu) * lax.rsqrt(var + eps) * gamma + beta
    out = out + x
    return jnp.where(out >= 0, out, negative_slope * out)


if __name__ == "__main__":
    key = jax.random.PRNGKey(0)
    B, C, H, W = 2, 4, 16, 16
    key, kx, kp = jax.random.split(key, 3)
    x = jax.random.normal(kx, (B, C, H, W), jnp.float32)
    params = init_params(kp, C, kernel_size=3, padding=1, dilation=1)

    out = destyle_gram_res_block(x, params)
    out = jax.block_until_ready(out)
    assert out.shape == (B, C, H, W)

    ref = reference_block(x, params)
    err = float(jnp.max(jnp.abs(out - ref)))
    assert err < 1e-2, f"mismatch vs reference: max |diff| = {err}"

    print("KERNEL_OK")
</pallas_src>

<mosaic_0001>
module attributes {stable_mosaic.version = 11 : i64} {
  func.func @_gram_destyler_kernel(%arg0: i32, %arg1: memref<2x4x512xf32, #tpu.memory_space<vmem>>, %arg2: memref<4x4x128xbf16, #tpu.memory_space<vmem>>, %arg3: memref<1x128xf32, #tpu.memory_space<vmem>>, %arg4: memref<128x128xbf16, #tpu.memory_space<vmem>>, %arg5: memref<1x128xf32, #tpu.memory_space<vmem>>, %arg6: memref<128x128xbf16, #tpu.memory_space<vmem>>, %arg7: memref<1x128xf32, #tpu.memory_space<vmem>>, %arg8: memref<128x128xbf16, #tpu.memory_space<vmem>>, %arg9: memref<1x128xf32, #tpu.memory_space<vmem>>, %arg10: memref<128x128xbf16, #tpu.memory_space<vmem>>, %arg11: memref<1x128xf32, #tpu.memory_space<vmem>>, %arg12: memref<2x128xf32, #tpu.memory_space<vmem>>) attributes {dimension_semantics = [#tpu.dimension_semantics<parallel>], iteration_bounds = array<i64: 1>, scalar_prefetch = 0 : i64, scratch_operands = 0 : i64, tpu.core_type = #tpu.core_type<tc>, window_params = [{transform_indices = @transform_0, window_bounds = array<i64: 2, 4, 512>}, {pipeline_mode = #tpu.pipeline_mode<synchronous>, transform_indices = @transform_1, window_bounds = array<i64: 4, 4, 128>}, {pipeline_mode = #tpu.pipeline_mode<synchronous>, transform_indices = @transform_2, window_bounds = array<i64: 1, 128>}, {pipeline_mode = #tpu.pipeline_mode<synchronous>, transform_indices = @transform_3, window_bounds = array<i64: 128, 128>}, {pipeline_mode = #tpu.pipeline_mode<synchronous>, transform_indices = @transform_4, window_bounds = array<i64: 1, 128>}, {pipeline_mode = #tpu.pipeline_mode<synchronous>, transform_indices = @transform_5, window_bounds = array<i64: 128, 128>}, {pipeline_mode = #tpu.pipeline_mode<synchronous>, transform_indices = @transform_6, window_bounds = array<i64: 1, 128>}, {pipeline_mode = #tpu.pipeline_mode<synchronous>, transform_indices = @transform_7, window_bounds = array<i64: 128, 128>}, {pipeline_mode = #tpu.pipeline_mode<synchronous>, transform_indices = @transform_8, window_bounds = array<i64: 1, 128>}, {pipeline_mode = #tpu.pipeline_mode<synchronous>, transform_indices = @transform_9, window_bounds = array<i64: 128, 128>}, {pipeline_mode = #tpu.pipeline_mode<synchronous>, transform_indices = @transform_10, window_bounds = array<i64: 1, 128>}, {transform_indices = @transform_11, window_bounds = array<i64: 2, 128>}]} {
    %c0 = arith.constant 0 : index
    %c0_0 = arith.constant 0 : index
    %c0_1 = arith.constant 0 : index
    %0 = vector.load %arg1[%c0, %c0_0, %c0_1] : memref<2x4x512xf32, #tpu.memory_space<vmem>>, vector<1x4x512xf32>
    %1 = vector.shape_cast %0 : vector<1x4x512xf32> to vector<4x512xf32>
    %2 = arith.truncf %1 : vector<4x512xf32> to vector<4x512xbf16>
    %cst = arith.constant dense<0.000000e+00> : vector<4x4xf32>
    %3 = tpu.matmul %2, %2, %cst {dimension_numbers = #tpu.dot_dimension_numbers<[1], [1], [0], [0], [0, 0, 1, 0], [], []>} : vector<4x512xbf16>, vector<4x512xbf16>, vector<4x4xf32> -> vector<4x4xf32>
    %cst_2 = arith.constant 3.906250e-03 : f32
    %4 = vector.broadcast %cst_2 : f32 to vector<4x4xf32>
    %5 = arith.mulf %3, %4 : vector<4x4xf32>
    %cst_3 = arith.constant 0.000000e+00 : f32
    %6 = vector.broadcast %cst_3 : f32 to vector<1x128xf32>
    %7 = vector.extract_strided_slice %5 {offsets = [0, 0], sizes = [1, 4], strides = [1, 1]} : vector<4x4xf32> to vector<1x4xf32>
    %8 = arith.truncf %7 : vector<1x4xf32> to vector<1x4xbf16>
    %c0_4 = arith.constant 0 : index
    %c0_5 = arith.constant 0 : index
    %c0_6 = arith.constant 0 : index
    %9 = vector.load %arg2[%c0_4, %c0_5, %c0_6] : memref<4x4x128xbf16, #tpu.memory_space<vmem>>, vector<1x4x128xbf16>
    %10 = vector.shape_cast %9 : vector<1x4x128xbf16> to vector<4x128xbf16>
    %cst_7 = arith.constant dense<0.000000e+00> : vector<1x128xf32>
    %11 = tpu.matmul %8, %10, %cst_7 {dimension_numbers = #tpu.dot_dimension_numbers<[1], [0], [0], [1], [0, 0, 1, 1], [], []>} : vector<1x4xbf16>, vector<4x128xbf16>, vector<1x128xf32> -> vector<1x128xf32>
    %12 = arith.addf %6, %11 : vector<1x128xf32>
    %13 = vector.extract_strided_slice %5 {offsets = [1, 0], sizes = [1, 4], strides = [1, 1]} : vector<4x4xf32> to vector<1x4xf32>
    %14 = arith.truncf %13 : vector<1x4xf32> to vector<1x4xbf16>
    %c1 = arith.constant 1 : index
    %c0_8 = arith.constant 0 : index
    %c0_9 = arith.constant 0 : index
    %15 = vector.load %arg2[%c1, %c0_8, %c0_9] : memref<4x4x128xbf16, #tpu.memory_space<vmem>>, vector<1x4x128xbf16>
    %16 = vector.shape_cast %15 : vector<1x4x128xbf16> to vector<4x128xbf16>
    %cst_10 = arith.constant dense<0.000000e+00> : vector<1x128xf32>
    %17 = tpu.matmul %14, %16, %cst_10 {dimension_numbers = #tpu.dot_dimension_numbers<[1], [0], [0], [1], [0, 0, 1, 1], [], []>} : vector<1x4xbf16>, vector<4x128xbf16>, vector<1x128xf32> -> vector<1x128xf32>
    %18 = arith.addf %12, %17 : vector<1x128xf32>
    %19 = vector.extract_strided_slice %5 {offsets = [2, 0], sizes = [1, 4], strides = [1, 1]} : vector<4x4xf32> to vector<1x4xf32>
    %20 = arith.truncf %19 : vector<1x4xf32> to vector<1x4xbf16>
    %c2 = arith.constant 2 : index
    %c0_11 = arith.constant 0 : index
    %c0_12 = arith.constant 0 : index
    %21 = vector.load %arg2[%c2, %c0_11, %c0_12] : memref<4x4x128xbf16, #tpu.memory_space<vmem>>, vector<1x4x128xbf16>
    %22 = vector.shape_cast %21 : vector<1x4x128xbf16> to vector<4x128xbf16>
    %cst_13 = arith.constant dense<0.000000e+00> : vector<1x128xf32>
    %23 = tpu.matmul %20, %22, %cst_13 {dimension_numbers = #tpu.dot_dimension_numbers<[1], [0], [0], [1], [0, 0, 1, 1], [], []>} : vector<1x4xbf16>, vector<4x128xbf16>, vector<1x128xf32> -> vector<1x128xf32>
    %24 = arith.addf %18, %23 : vector<1x128xf32>
    %25 = vector.extract_strided_slice %5 {offsets = [3, 0], sizes = [1, 4], strides = [1, 1]} : vector<4x4xf32> to vector<1x4xf32>
    %26 = arith.truncf %25 : vector<1x4xf32> to vector<1x4xbf16>
    %c3 = arith.constant 3 : index
    %c0_14 = arith.constant 0 : index
    %c0_15 = arith.constant 0 : index
    %27 = vector.load %arg2[%c3, %c0_14, %c0_15] : memref<4x4x128xbf16, #tpu.memory_space<vmem>>, vector<1x4x128xbf16>
    %28 = vector.shape_cast %27 : vector<1x4x128xbf16> to vector<4x128xbf16>
    %cst_16 = arith.constant dense<0.000000e+00> : vector<1x128xf32>
    %29 = tpu.matmul %26, %28, %cst_16 {dimension_numbers = #tpu.dot_dimension_numbers<[1], [0], [0], [1], [0, 0, 1, 1], [], []>} : vector<1x4xbf16>, vector<4x128xbf16>, vector<1x128xf32> -> vector<1x128xf32>
    %30 = arith.addf %24, %29 : vector<1x128xf32>
    %c1_17 = arith.constant 1 : index
    %c0_18 = arith.constant 0 : index
    %c0_19 = arith.constant 0 : index
    %31 = vector.load %arg1[%c1_17, %c0_18, %c0_19] : memref<2x4x512xf32, #tpu.memory_space<vmem>>, vector<1x4x512xf32>
    %32 = vector.shape_cast %31 : vector<1x4x512xf32> to vector<4x512xf32>
    %33 = arith.truncf %32 : vector<4x512xf32> to vector<4x512xbf16>
    %cst_20 = arith.constant dense<0.000000e+00> : vector<4x4xf32>
    %34 = tpu.matmul %33, %33, %cst_20 {dimension_numbers = #tpu.dot_dimension_numbers<[1], [1], [0], [0], [0, 0, 1, 0], [], []>} : vector<4x512xbf16>, vector<4x512xbf16>, vector<4x4xf32> -> vector<4x4xf32>
    %cst_21 = arith.constant 3.906250e-03 : f32
    %35 = vector.broadcast %cst_21 : f32 to vector<4x4xf32>
    %36 = arith.mulf %34, %35 : vector<4x4xf32>
    %cst_22 = arith.constant 0.000000e+00 : f32
    %37 = vector.broadcast %cst_22 : f32 to vector<1x128xf32>
    %38 = vector.extract_strided_slice %36 {offsets = [0, 0], sizes = [1, 4], strides = [1, 1]} : vector<4x4xf32> to vector<1x4xf32>
    %39 = arith.truncf %38 : vector<1x4xf32> to vector<1x4xbf16>
    %c0_23 = arith.constant 0 : index
    %c0_24 = arith.constant 0 : index
    %c0_25 = arith.constant 0 : index
    %40 = vector.load %arg2[%c0_23, %c0_24, %c0_25] : memref<4x4x128xbf16, #tpu.memory_space<vmem>>, vector<1x4x128xbf16>
    %41 = vector.shape_cast %40 : vector<1x4x128xbf16> to vector<4x128xbf16>
    %cst_26 = arith.constant dense<0.000000e+00> : vector<1x128xf32>
    %42 = tpu.matmul %39, %41, %cst_26 {dimension_numbers = #tpu.dot_dimension_numbers<[1], [0], [0], [1], [0, 0, 1, 1], [], []>} : vector<1x4xbf16>, vector<4x128xbf16>, vector<1x128xf32> -> vector<1x128xf32>
    %43 = arith.addf %37, %42 : vector<1x128xf32>
    %44 = vector.extract_strided_slice %36 {offsets = [1, 0], sizes = [1, 4], strides = [1, 1]} : vector<4x4xf32> to vector<1x4xf32>
    %45 = arith.truncf %44 : vector<1x4xf32> to vector<1x4xbf16>
    %c1_27 = arith.constant 1 : index
    %c0_28 = arith.constant 0 : index
    %c0_29 = arith.constant 0 : index
    %46 = vector.load %arg2[%c1_27, %c0_28, %c0_29] : memref<4x4x128xbf16, #tpu.memory_space<vmem>>, vector<1x4x128xbf16>
    %47 = vector.shape_cast %46 : vector<1x4x128xbf16> to vector<4x128xbf16>
    %cst_30 = arith.constant dense<0.000000e+00> : vector<1x128xf32>
    %48 = tpu.matmul %45, %47, %cst_30 {dimension_numbers = #tpu.dot_dimension_numbers<[1], [0], [0], [1], [0, 0, 1, 1], [], []>} : vector<1x4xbf16>, vector<4x128xbf16>, vector<1x128xf32> -> vector<1x128xf32>
    %49 = arith.addf %43, %48 : vector<1x128xf32>
    %50 = vector.extract_strided_slice %36 {offsets = [2, 0], sizes = [1, 4], strides = [1, 1]} : vector<4x4xf32> to vector<1x4xf32>
    %51 = arith.truncf %50 : vector<1x4xf32> to vector<1x4xbf16>
    %c2_31 = arith.constant 2 : index
    %c0_32 = arith.constant 0 : index
    %c0_33 = arith.constant 0 : index
    %52 = vector.load %arg2[%c2_31, %c0_32, %c0_33] : memref<4x4x128xbf16, #tpu.memory_space<vmem>>, vector<1x4x128xbf16>
    %53 = vector.shape_cast %52 : vector<1x4x128xbf16> to vector<4x128xbf16>
    %cst_34 = arith.constant dense<0.000000e+00> : vector<1x128xf32>
    %54 = tpu.matmul %51, %53, %cst_34 {dimension_numbers = #tpu.dot_dimension_numbers<[1], [0], [0], [1], [0, 0, 1, 1], [], []>} : vector<1x4xbf16>, vector<4x128xbf16>, vector<1x128xf32> -> vector<1x128xf32>
    %55 = arith.addf %49, %54 : vector<1x128xf32>
    %56 = vector.extract_strided_slice %36 {offsets = [3, 0], sizes = [1, 4], strides = [1, 1]} : vector<4x4xf32> to vector<1x4xf32>
    %57 = arith.truncf %56 : vector<1x4xf32> to vector<1x4xbf16>
    %c3_35 = arith.constant 3 : index
    %c0_36 = arith.constant 0 : index
    %c0_37 = arith.constant 0 : index
    %58 = vector.load %arg2[%c3_35, %c0_36, %c0_37] : memref<4x4x128xbf16, #tpu.memory_space<vmem>>, vector<1x4x128xbf16>
    %59 = vector.shape_cast %58 : vector<1x4x128xbf16> to vector<4x128xbf16>
    %cst_38 = arith.constant dense<0.000000e+00> : vector<1x128xf32>
    %60 = tpu.matmul %57, %59, %cst_38 {dimension_numbers = #tpu.dot_dimension_numbers<[1], [0], [0], [1], [0, 0, 1, 1], [], []>} : vector<1x4xbf16>, vector<4x128xbf16>, vector<1x128xf32> -> vector<1x128xf32>
    %61 = arith.addf %55, %60 : vector<1x128xf32>
    %62 = tpu.concatenate %30, %61 in 0 : vector<1x128xf32>, vector<1x128xf32> -> vector<2x128xf32>
    %c0_39 = arith.constant 0 : index
    %c0_40 = arith.constant 0 : index
    %63 = vector.load %arg3[%c0_39, %c0_40] : memref<1x128xf32, #tpu.memory_space<vmem>>, vector<1x128xf32>
    %64 = vector.broadcast %63 : vector<1x128xf32> to vector<2x128xf32>
    %65 = arith.addf %62, %64 : vector<2x128xf32>
    %66 = arith.truncf %65 : vector<2x128xf32> to vector<2x128xbf16>
    %c0_41 = arith.constant 0 : index
    %c0_42 = arith.constant 0 : index
    %67 = vector.load %arg4[%c0_41, %c0_42] : memref<128x128xbf16, #tpu.memory_space<vmem>>, vector<128x128xbf16>
    %cst_43 = arith.constant dense<0.000000e+00> : vector<2x128xf32>
    %68 = tpu.matmul %66, %67, %cst_43 {dimension_numbers = #tpu.dot_dimension_numbers<[1], [0], [0], [1], [0, 0, 1, 1], [], []>} : vector<2x128xbf16>, vector<128x128xbf16>, vector<2x128xf32> -> vector<2x128xf32>
    %c0_44 = arith.constant 0 : index
    %c0_45 = arith.constant 0 : index
    %69 = vector.load %arg5[%c0_44, %c0_45] : memref<1x128xf32, #tpu.memory_space<vmem>>, vector<1x128xf32>
    %70 = vector.broadcast %69 : vector<1x128xf32> to vector<2x128xf32>
    %71 = arith.addf %68, %70 : vector<2x128xf32>
    %72 = arith.truncf %71 : vector<2x128xf32> to vector<2x128xbf16>
    %c0_46 = arith.constant 0 : index
    %c0_47 = arith.constant 0 : index
    %73 = vector.load %arg6[%c0_46, %c0_47] : memref<128x128xbf16, #tpu.memory_space<vmem>>, vector<128x128xbf16>
    %cst_48 = arith.constant dense<0.000000e+00> : vector<2x128xf32>
    %74 = tpu.matmul %72, %73, %cst_48 {dimension_numbers = #tpu.dot_dimension_numbers<[1], [0], [0], [1], [0, 0, 1, 1], [], []>} : vector<2x128xbf16>, vector<128x128xbf16>, vector<2x128xf32> -> vector<2x128xf32>
    %c0_49 = arith.constant 0 : index
    %c0_50 = arith.constant 0 : index
    %75 = vector.load %arg7[%c0_49, %c0_50] : memref<1x128xf32, #tpu.memory_space<vmem>>, vector<1x128xf32>
    %76 = vector.broadcast %75 : vector<1x128xf32> to vector<2x128xf32>
    %77 = arith.addf %74, %76 : vector<2x128xf32>
    %78 = arith.truncf %77 : vector<2x128xf32> to vector<2x128xbf16>
    %c0_51 = arith.constant 0 : index
    %c0_52 = arith.constant 0 : index
    %79 = vector.load %arg8[%c0_51, %c0_52] : memref<128x128xbf16, #tpu.memory_space<vmem>>, vector<128x128xbf16>
    %cst_53 = arith.constant dense<0.000000e+00> : vector<2x128xf32>
    %80 = tpu.matmul %78, %79, %cst_53 {dimension_numbers = #tpu.dot_dimension_numbers<[1], [0], [0], [1], [0, 0, 1, 1], [], []>} : vector<2x128xbf16>, vector<128x128xbf16>, vector<2x128xf32> -> vector<2x128xf32>
    %c0_54 = arith.constant 0 : index
    %c0_55 = arith.constant 0 : index
    %81 = vector.load %arg9[%c0_54, %c0_55] : memref<1x128xf32, #tpu.memory_space<vmem>>, vector<1x128xf32>
    %82 = vector.broadcast %81 : vector<1x128xf32> to vector<2x128xf32>
    %83 = arith.addf %80, %82 : vector<2x128xf32>
    %84 = arith.truncf %83 : vector<2x128xf32> to vector<2x128xbf16>
    %c0_56 = arith.constant 0 : index
    %c0_57 = arith.constant 0 : index
    %85 = vector.load %arg10[%c0_56, %c0_57] : memref<128x128xbf16, #tpu.memory_space<vmem>>, vector<128x128xbf16>
    %cst_58 = arith.constant dense<0.000000e+00> : vector<2x128xf32>
    %86 = tpu.matmul %84, %85, %cst_58 {dimension_numbers = #tpu.dot_dimension_numbers<[1], [0], [0], [1], [0, 0, 1, 1], [], []>} : vector<2x128xbf16>, vector<128x128xbf16>, vector<2x128xf32> -> vector<2x128xf32>
    %c0_59 = arith.constant 0 : index
    %c0_60 = arith.constant 0 : index
    %87 = vector.load %arg11[%c0_59, %c0_60] : memref<1x128xf32, #tpu.memory_space<vmem>>, vector<1x128xf32>
    %88 = vector.broadcast %87 : vector<1x128xf32> to vector<2x128xf32>
    %89 = arith.addf %86, %88 : vector<2x128xf32>
    %c0_61 = arith.constant 0 : index
    %c0_62 = arith.constant 0 : index
    %90 = vector.load %arg12[%c0_61, %c0_62] : memref<2x128xf32, #tpu.memory_space<vmem>>, vector<2x128xf32>
    tpu.vector_store %arg12[%c0_61, %c0_62], %89 {strides = array<i32>} : memref<2x128xf32, #tpu.memory_space<vmem>>, vector<2x128xf32>,
    return
  }
  func.func @transform_0(%arg0: i32) -> (i32, i32, i32) {
    %c0_i32 = arith.constant 0 : i32
    %c0_i32_0 = arith.constant 0 : i32
    %c0_i32_1 = arith.constant 0 : i32
    return %arg0, %c0_i32, %c0_i32_0 : i32, i32, i32
  }
  func.func @transform_1(%arg0: i32) -> (i32, i32, i32) {
    %c0_i32 = arith.constant 0 : i32
    %c0_i32_0 = arith.constant 0 : i32
    %c0_i32_1 = arith.constant 0 : i32
    %c0_i32_2 = arith.constant 0 : i32
    return %c0_i32, %c0_i32_0, %c0_i32_1 : i32, i32, i32
  }
  func.func @transform_2(%arg0: i32) -> (i32, i32) {
    %c0_i32 = arith.constant 0 : i32
    %c0_i32_0 = arith.constant 0 : i32
    %c0_i32_1 = arith.constant 0 : i32
    return %c0_i32, %c0_i32_0 : i32, i32
  }
  func.func @transform_3(%arg0: i32) -> (i32, i32) {
    %c0_i32 = arith.constant 0 : i32
    %c0_i32_0 = arith.constant 0 : i32
    %c0_i32_1 = arith.constant 0 : i32
    return %c0_i32, %c0_i32_0 : i32, i32
  }
  func.func @transform_4(%arg0: i32) -> (i32, i32) {
    %c0_i32 = arith.constant 0 : i32
    %c0_i32_0 = arith.constant 0 : i32
    %c0_i32_1 = arith.constant 0 : i32
    return %c0_i32, %c0_i32_0 : i32, i32
  }
  func.func @transform_5(%arg0: i32) -> (i32, i32) {
    %c0_i32 = arith.constant 0 : i32
    %c0_i32_0 = arith.constant 0 : i32
    %c0_i32_1 = arith.constant 0 : i32
    return %c0_i32, %c0_i32_0 : i32, i32
  }
  func.func @transform_6(%arg0: i32) -> (i32, i32) {
    %c0_i32 = arith.constant 0 : i32
    %c0_i32_0 = arith.constant 0 : i32
    %c0_i32_1 = arith.constant 0 : i32
    return %c0_i32, %c0_i32_0 : i32, i32
  }
  func.func @transform_7(%arg0: i32) -> (i32, i32) {
    %c0_i32 = arith.constant 0 : i32
    %c0_i32_0 = arith.constant 0 : i32
    %c0_i32_1 = arith.constant 0 : i32
    return %c0_i32, %c0_i32_0 : i32, i32
  }
  func.func @transform_8(%arg0: i32) -> (i32, i32) {
    %c0_i32 = arith.constant 0 : i32
    %c0_i32_0 = arith.constant 0 : i32
    %c0_i32_1 = arith.constant 0 : i32
    return %c0_i32, %c0_i32_0 : i32, i32
  }
  func.func @transform_9(%arg0: i32) -> (i32, i32) {
    %c0_i32 = arith.constant 0 : i32
    %c0_i32_0 = arith.constant 0 : i32
    %c0_i32_1 = arith.constant 0 : i32
    return %c0_i32, %c0_i32_0 : i32, i32
  }
  func.func @transform_10(%arg0: i32) -> (i32, i32) {
    %c0_i32 = arith.constant 0 : i32
    %c0_i32_0 = arith.constant 0 : i32
    %c0_i32_1 = arith.constant 0 : i32
    return %c0_i32, %c0_i32_0 : i32, i32
  }
  func.func @transform_11(%arg0: i32) -> (i32, i32) {
    %c0_i32 = arith.constant 0 : i32
    %c0_i32_0 = arith.constant 0 : i32
    return %arg0, %c0_i32 : i32, i32
  }
}

</mosaic_0001>

<bundles_post_ra>
// kernel: tpu_custom_call.1
= control target key start
LH: loop header
LB: loop body
LE: loop exit
PB: predicated region body
PF: predicated region fallthrough
CT: control target
= control target key end

     0   :  { %16 = vsyncpa [#allocation3], 0  ;;  %s1806_s0 = inlined_call_operand.hbm [shape: f32[2,4,512], index: 0, kind: input, shape index: {}]   ;;  %s1807_s1 = inlined_call_operand.hbm [shape: bf16[4,4,128], index: 1, kind: input, shape index: {}]   ;;  %s1808_s2 = inlined_call_operand.vmem [shape: f32[1,128], index: 2, kind: input, shape index: {}]   ;;  %s1809_s3 = inlined_call_operand.hbm [shape: bf16[128,128], index: 3, kind: input, shape index: {}]   ;;  %s1810_s4 = inlined_call_operand.vmem [shape: f32[1,128], index: 4, kind: input, shape index: {}]   ;;  %s1811_s5 = inlined_call_operand.hbm [shape: bf16[128,128], index: 5, kind: input, shape index: {}]   ;;  %s1812_s6 = inlined_call_operand.vmem [shape: f32[1,128], index: 6, kind: input, shape index: {}]   ;;  %s1813_s7 = inlined_call_operand.hbm [shape: bf16[128,128], index: 7, kind: input, shape index: {}]   ;;  %s1814_s8 = inlined_call_operand.vmem [shape: f32[1,128], index: 8, kind: input, shape index: {}]   ;;  %s1815_s9 = inlined_call_operand.hbm [shape: bf16[128,128], index: 9, kind: input, shape index: {}]   ;;  %s1816_s10 = inlined_call_operand.vmem [shape: f32[1,128], index: 10, kind: input, shape index: {}]   ;;  %s1817_s11 = inlined_call_operand.hbm [shape: f32[2,128], index: 11, kind: output, shape index: {}]  }
   0x1   :  { %17 = vsyncpa [#allocation6], 0 }
   0x2   :  { %18 = vsyncpa [#allocation9], 0 }
   0x3   :  { %19 = vsyncpa [#allocation12], 0 }
   0x4   :  { %20 = vsyncpa [#allocation4], 0  ;;  %s1596_s17 = smov [#allocation5]  }
   0x5   :  { %s38_s18 = sshll.u32 %s1596_s17, 4  ;;  %s39_s18 = int_to_ptr.vmem [resolvable:$true] %s38_s18 }
   0x6   :  { %s1454_s19 = scalar_lea.vmem %s39_s18, 128  ;;  %p1459_p1 = scmp.lt.s32.totalorder %s39_s18, %s39_s18 }
   0x7   :  { %p1455_p0 = scmp.ne.s32.totalorder %s39_s18, %s1454_s19  ;;  %p1460_p2 = scmp.lt.s32.totalorder %s1454_s19, %s1454_s19 }
   0x9   :  { %p1461_p3 = por %p1460_p2, %p1459_p1 }
   0xb   :  { %p1462_p4 = pnand %p1461_p3, %p1455_p0 }
   0xd   :  { %1465 = shalt.err (!%p1462_p4)
}
   0xe   :  { %s1597_s20 = smov 32   ;;  %s1598_s21 = smov 2  }
   0xf   :  { %44 = dma.hbm_to_vmem [thread:$0]  %s1807_s1, 128, %s39_s18, [#allocation6], %s1597_s20, %s1597_s20, %s1598_s21  }
  0x10   :  { %s1599_s24 = smov [#allocation8]   ;;  %s1600_s26 = smov [#allocation2]  }
  0x11   :  { %s66_s25 = sshll.u32 %s1599_s24, 4  ;;  %s26_s27 = sshll.u32 %s1600_s26, 4  ;;  %s67_s25 = int_to_ptr.vmem [resolvable:$true] %s66_s25  ;;  %s27_s27 = int_to_ptr.vmem [resolvable:$true] %s26_s27 }
  0x12   :  { %s1474_s28 = scalar_lea.vmem %s67_s25, 1024  ;;  %p1479_p6 = scmp.lt.s32.totalorder %s67_s25, %s67_s25 }
  0x13   :  { %p1475_p5 = scmp.ne.s32.totalorder %s67_s25, %s1474_s28  ;;  %p1480_p7 = scmp.lt.s32.totalorder %s1474_s28, %s1474_s28 }
  0x15   :  { %p1481_p8 = por %p1480_p7, %p1479_p6 }
  0x17   :  { %p1482_p9 = pnand %p1481_p8, %p1475_p5 }
  0x19   :  { %1485 = shalt.err (!%p1482_p9)
}
  0x1a   :  { %s1601_s29 = smov 64   ;;  %s1602_s30 = smov 4  }
  0x1b   :  { %72 = dma.hbm_to_vmem [thread:$0]  %s1811_s5, 1024, %s67_s25, [#allocation9], %s1601_s29, %s1601_s29, %s1602_s30  }
  0x1c   :  { %s1494_s1 = scalar_lea.vmem %s27_s27, 512  ;;  %p1499_p11 = scmp.lt.s32.totalorder %s27_s27, %s27_s27 }
  0x1d   :  { %p1495_p10 = scmp.ne.s32.totalorder %s27_s27, %s1494_s1  ;;  %p1500_p12 = scmp.lt.s32.totalorder %s1494_s1, %s1494_s1 }
  0x1f   :  { %p1501_p13 = por %p1500_p12, %p1499_p11 }
  0x21   :  { %p1502_p0 = pnand %p1501_p13, %p1495_p10 }
  0x23   :  { %1505 = shalt.err (!%p1502_p0)
}
  0x24   :  { %s1603_s14 = smov 256   ;;  %s1604_s15 = smov 16  }
  0x25   :  { %32 = dma.hbm_to_vmem [thread:$0]  %s1806_s0, 512, %s27_s27, [#allocation3], %s1603_s14, %s1603_s14, %s1604_s15  }
  0x26   :  { %s1605_s18 = smov [#allocation7]   ;;  %s1606_s20 = smov [#allocation10]  }
  0x27   :  { %s52_s19 = sshll.u32 %s1605_s18, 4  ;;  %s80_s21 = sshll.u32 %s1606_s20, 4  ;;  %s53_s19 = int_to_ptr.vmem [resolvable:$true] %s52_s19  ;;  %s81_s21 = int_to_ptr.vmem [resolvable:$true] %s80_s21 }
  0x28   :  { %s1514_s5 = scalar_lea.vmem %s53_s19, 1024  ;;  %p1519_p2 = scmp.lt.s32.totalorder %s53_s19, %s53_s19 }
  0x29   :  { %p1515_p1 = scmp.ne.s32.totalorder %s53_s19, %s1514_s5  ;;  %p1520_p3 = scmp.lt.s32.totalorder %s1514_s5, %s1514_s5 }
  0x2b   :  { %p1521_p4 = por %p1520_p3, %p1519_p2 }
  0x2d   :  { %p1522_p5 = pnand %p1521_p4, %p1515_p1 }
  0x2f   :  { %1525 = shalt.err (!%p1522_p5)
}
  0x30   :  { %58 = dma.hbm_to_vmem [thread:$0]  %s1809_s3, 1024, %s53_s19, [#allocation6], %s1601_s29, %s1601_s29, %s1602_s30  }
  0x31   :  { %s1534_s0 = scalar_lea.vmem %s81_s21, 1024  ;;  %p1539_p7 = scmp.lt.s32.totalorder %s81_s21, %s81_s21 }
  0x32   :  { %p1535_p6 = scmp.ne.s32.totalorder %s81_s21, %s1534_s0  ;;  %p1540_p8 = scmp.lt.s32.totalorder %s1534_s0, %s1534_s0 }
  0x34   :  { %p1541_p9 = por %p1540_p8, %p1539_p7 }
  0x36   :  { %p1542_p10 = pnand %p1541_p9, %p1535_p6 }
  0x38   :  { %1545 = shalt.err (!%p1542_p10)
}
  0x39   :  { %86 = dma.hbm_to_vmem [thread:$0]  %s1813_s7, 1024, %s81_s21, [#allocation9], %s1601_s29, %s1601_s29, %s1602_s30  }
  0x3a   :  { %s1607_s26 = smov [#allocation11]  }
  0x3b   :  { %s94_s27 = sshll.u32 %s1607_s26, 4  ;;  %s95_s27 = int_to_ptr.vmem [resolvable:$true] %s94_s27 }
  0x3c   :  { %s1554_s28 = scalar_lea.vmem %s95_s27, 1024  ;;  %p1559_p12 = scmp.lt.s32.totalorder %s95_s27, %s95_s27 }
  0x3d   :  { %p1555_p11 = scmp.ne.s32.totalorder %s95_s27, %s1554_s28  ;;  %p1560_p13 = scmp.lt.s32.totalorder %s1554_s28, %s1554_s28 }
  0x3f   :  { %p1561_p0 = por %p1560_p13, %p1559_p12 }
  0x41   :  { %p1562_p1 = pnand %p1561_p0, %p1555_p11 }
  0x43   :  { %1565 = shalt.err (!%p1562_p1)
}
  0x44   :  { %100 = dma.hbm_to_vmem [thread:$0]  %s1815_s9, 1024, %s95_s27, [#allocation12], %s1601_s29, %s1601_s29, %s1602_s30  }
  0x45   :  { %1586 = dma.done.wait [#allocation3], 512  }
  0x46   :  { %1587 = vsyncadd [#allocation3], 4294966784 }
  0x47   :  { %1588 = dma.done.wait [#allocation6], 1152  }
  0x48   :  { %1589 = vsyncadd [#allocation6], 4294966144 }
  0x49   :  { %1590 = dma.done.wait [#allocation9], 2048  }
  0x4a   :  { %1591 = vsyncadd [#allocation9], 4294965248 }
  0x4b   :  { %1592 = dma.done.wait [#allocation12], 1024  }
  0x4c   :  { %1593 = vsyncadd [#allocation12], 4294966272  ;;  %v122_v0 = vld [vmem:[#allocation2] sm:$0xff]  ;;  %v123_v1 = vld [vmem:[#allocation2 + $0x8] sm:$0xff]  ;;  %vm226_vm0 = vcmask 1041408   ;;  %v1608_v9 = vmov 0.0  }
  0x4d   :  { %v126_v2 = vcombine.high %v122_v0, %v122_v0  ;;  %v127_v3 = vcombine.high %v123_v1, %v123_v1  ;;  %v130_v4 = vpack.c.bf16 %v122_v0, %v122_v0  ;;  %v132_v5 = vpack.c.bf16 %v123_v1, %v123_v1  ;;  %v216_v8 = vld [vmem:[#allocation5] sm:$0x3]  ;;  %v218_v11 = vld [vmem:[#allocation5 + $0x2] sm:$0x3]  ;;  %v418_v13 = vld [vmem:[#allocation2 + $0x18] sm:$0xff]  ;;  %s1610_s15 = smov [#allocation13]  }
  0x4e   :  { %v273_v10 = vsel %vm226_vm0, %v216_v8, 0  ;;  %v228_v12 = vsel %vm226_vm0, %v218_v11, 0  ;;  %vm1609_vm1 = vmmov 0   ;;  %v417_v16 = vld [vmem:[#allocation2 + $0x10] sm:$0xff]  ;;  %v422_v18 = vcombine.high %v418_v13, %v418_v13  ;;  %v367_v21 = vld [vmem:[#allocation5 + $0x6] sm:$0x3] }
  0x4f   :  { %v131_v6 = vpack.c.bf16 %v126_v2, %v126_v2  ;;  %v133_v7 = vpack.c.bf16 %v127_v3, %v127_v3  ;;  %v421_v23 = vcombine.high %v417_v16, %v417_v16  ;;  %vm222_vm2 = vcmask 31744   ;;  %v316_v26 = vld [vmem:[#allocation5 + $0x4] sm:$0x3]  ;;  %v1416_v11 = vld [vmem:[#allocation7 + $0x28] sm:$0xff]   ;;  %s1158_s16 = sshll.u32 %s1610_s15, 4  ;;  %s1159_s16 = int_to_ptr.vmem [resolvable:$true] %s1158_s16 }
  0x50   :  { %v1712_v28 = vsel %vm226_vm0, %v367_v21, 0  ;;  %v428_v29 = vpack.c.bf16 %v422_v18, %v422_v18  ;;  %v1716_v33 = vsel %vm226_vm0, %v316_v26, 0  ;;  %v427_v35 = vpack.c.bf16 %v418_v13, %v418_v13  ;;  %v1418_v13 = vld [vmem:[#allocation7 + $0x18] sm:$0xff]   ;;  %v1423_v18 = vld [vmem:[#allocation8 + $0x30] sm:$0xff]   ;;  %p1571_p3 = scmp.lt.s32.totalorder %s1159_s16, %s1159_s16 }
  0x51   :  { %148 = vmatprep.subr.bf16.mxu0 %v131_v6  ;;  %188 = vmatprep.subr.bf16.mxu1 %v133_v7  ;;  %v426_v34 = vpack.c.bf16 %v421_v23, %v421_v23  ;;  %v425_v37 = vpack.c.bf16 %v417_v16, %v417_v16  ;;  %v1421_v16 = vld [vmem:[#allocation7] sm:$0xff]   ;;  %v1426_v21 = vld [vmem:[#allocation8 + $0x18] sm:$0xff]   ;;  %v1428_v23 = vld [vmem:[#allocation8 + $0x8] sm:$0xff]   ;;  %vm693_vm3 = vcmask 1040384  }
  0x52   :  { %149 = vmatpush1.bf16.xpose.msra.mxu0 %v130_v4  ;;  %189 = vmatpush1.bf16.xpose.msra.mxu1 %v132_v5 }
  0x53   :  { %166 = vmatprep.mubr.bf16.mxu0 %v131_v6  ;;  %206 = vmatprep.mubr.bf16.mxu1 %v133_v7  ;;  %v1414_v7 = vld [vmem:[#allocation7 + $0x38] sm:$0xff]  }
  0x54   :  { %1267 = vmatprep.subr.bf16.mxu0 %v1608_v9  ;;  %1273 = vmatprep.subr.bf16.mxu1 %v1608_v9 }
  0x59   :  { %167 = vmatmul.mubr.bf16.vlgmr.msra.gmra.mxu0 %v130_v4  ;;  %207 = vmatmul.mubr.bf16.vlgmr.msra.gmra.mxu1 %v132_v5 }
  0x5a   :  { %1274 = vmatpush3.bf16.msra.mxu1 %v273_v10  ;;  %1268 = vmatpush3.bf16.msra.mxu0 %v228_v12 }
  0x5b   :  { %1285 = vmatprep.subr.bf16.mxu1 %v1608_v9  ;;  %1275 = vmatprep.mubr.msk.bf16.mxu1 %vm1609_vm1, %v1608_v9 }
  0x5c   :  { %1269 = vmatprep.mubr.msk.bf16.mxu0 %vm1609_vm1, %v1608_v9  ;;  %1279 = vmatprep.subr.bf16.mxu0 %v1608_v9 }
 0x119   :  { %v168_v14 = vpop.f32.mrf.mxu0  ;;  %v208_v15 = vpop.f32.mrf.mxu1 }
 0x11a   :  { %v209_v17 = vadd.f32 %v208_v15, %v168_v14  ;;  %v1419_v14 = vld [vmem:[#allocation7 + $0x10] sm:$0xff]   ;;  %v1420_v15 = vld [vmem:[#allocation7 + $0x8] sm:$0xff]  }
 0x11b   :  { %v170_v19 = vpop.f32.mrf.mxu0  ;;  %v210_v20 = vpop.f32.mrf.mxu1 }
 0x11c   :  { %v214_v22 = vmul.f32 0.00390625, %v209_v17  ;;  %v1422_v17 = vld [vmem:[#allocation8 + $0x38] sm:$0xff]   ;;  %v1424_v19 = vld [vmem:[#allocation8 + $0x28] sm:$0xff]   ;;  %v1425_v20 = vld [vmem:[#allocation8 + $0x20] sm:$0xff]  }
 0x11d   :  { %v171_v24 = vpop.f32.mrf.mxu0  ;;  %v211_v25 = vpop.f32.mrf.mxu1 }
 0x11e   :  { %v215_v27 = vpack.c.bf16 %v214_v22, %v214_v22  ;;  %v1427_v22 = vld [vmem:[#allocation8 + $0x10] sm:$0xff]  }
 0x11f   :  { %v172_v30 = vpop.f32.mrf.mxu0  ;;  %v212_v31 = vpop.f32.mrf.mxu1 }
 0x120   :  { %v220_v32 = vshrl.u32 %v215_v27, 16  ;;  %1276 = vmatmul.mubr.msk.bf16.vlgmr.msra.gmra.mxu1 %vm222_vm2, %v215_v27  ;;  %v318_v38 = vrot.slane %v215_v27, 1 }
 0x121   :  { %1286 = vmatpush3.bf16.msra.mxu1 %v1712_v28  ;;  %1287 = vmatprep.mubr.msk.bf16.mxu1 %vm1609_vm1, %v1608_v9 }
 0x122   :  { %1270 = vmatmul.mubr.msk.bf16.vlgmr.msra.gmra.mxu0 %vm222_vm2, %v220_v32  ;;  %483 = vmatprep.subr.bf16.mxu1 %v428_v29  ;;  %v368_v36 = vrot.slane %v220_v32, 1 }
 0x123   :  { %1280 = vmatpush3.bf16.msra.mxu0 %v1716_v33  ;;  %1281 = vmatprep.mubr.msk.bf16.mxu0 %vm1609_vm1, %v1608_v9 }
 0x124   :  { %443 = vmatprep.subr.bf16.mxu0 %v426_v34 }
 0x128   :  { %1288 = vmatmul.mubr.msk.bf16.vlgmr.msra.gmra.mxu1 %vm222_vm2, %v368_v36 }
 0x129   :  { %484 = vmatpush1.bf16.xpose.msra.mxu1 %v427_v35  ;;  %501 = vmatprep.mubr.bf16.mxu1 %v428_v29 }
 0x12a   :  { %1282 = vmatmul.mubr.msk.bf16.vlgmr.msra.gmra.mxu0 %vm222_vm2, %v318_v38  ;;  %1297 = vmatprep.subr.bf16.mxu1 %v1608_v9 }
 0x12b   :  { %444 = vmatpush1.bf16.xpose.msra.mxu0 %v425_v37  ;;  %461 = vmatprep.mubr.bf16.mxu0 %v426_v34 }
 0x12c   :  { %1291 = vmatprep.subr.bf16.mxu0 %v1608_v9 }
 0x130   :  { %502 = vmatmul.mubr.bf16.vlgmr.msra.gmra.mxu1 %v427_v35 }
 0x131   :  { %1298 = vmatpush3.bf16.msra.mxu1 %v273_v10  ;;  %1299 = vmatprep.mubr.msk.bf16.mxu1 %vm1609_vm1, %v1608_v9  ;;  %v1415_v10 = vld [vmem:[#allocation7 + $0x30] sm:$0xff]  }
 0x132   :  { %462 = vmatmul.mubr.bf16.vlgmr.msra.gmra.mxu0 %v425_v37  ;;  %1309 = vmatprep.subr.bf16.mxu1 %v1608_v9 }
 0x133   :  { %1292 = vmatpush3.bf16.msra.mxu0 %v228_v12  ;;  %1293 = vmatprep.mubr.msk.bf16.mxu0 %vm1609_vm1, %v1608_v9  ;;  %v1417_v12 = vld [vmem:[#allocation7 + $0x20] sm:$0xff]  }
 0x134   :  { %1303 = vmatprep.subr.bf16.mxu0 %v1608_v9 }
 0x1e0   :  { %v309_v39 = vpop.f32.mrf.mxu1 }
 0x1e2   :  { %v264_v40 = vpop.f32.mrf.mxu0  ;;  %v1277_v41 = vpop.f32.mrf.mxu1 }
 0x1e3   :  { %v310_v42 = vadd.f32 %v309_v39, %v264_v40 }
 0x1e4   :  { %v1271_v43 = vpop.f32.mrf.mxu0  ;;  %v312_v44 = vpop.f32.mrf.mxu1 }
 0x1e5   :  { %v1178_v43 = vld [vmem:[%s1808_s2] ss:$0 sm:$0xff] }
 0x1e6   :  { %v267_v45 = vpop.f32.mrf.mxu0  ;;  %v1278_v46 = vpop.f32.mrf.mxu1 }
 0x1e8   :  { %v1272_v47 = vpop.f32.mrf.mxu0  ;;  %v409_v48 = vpop.f32.mrf.mxu1 }
 0x1ea   :  { %v359_v49 = vpop.f32.mrf.mxu0  ;;  %v1289_v50 = vpop.f32.mrf.mxu1 }
 0x1eb   :  { %v365_v51 = vadd.f32 %v359_v49, %v310_v42  ;;  %v1430_v49 = vld [vmem:[#allocation10 + $0x38] sm:$0xff]   ;;  %v1431_v50 = vld [vmem:[#allocation10 + $0x30] sm:$0xff]  }
 0x1ec   :  { %v1283_v52 = vpop.f32.mrf.mxu0  ;;  %v412_v53 = vpop.f32.mrf.mxu1 }
 0x1ed   :  { %v1735_v54 = vadd.f32 %v409_v48, %v365_v51  ;;  %v1429_v48 = vld [vmem:[#allocation8] sm:$0xff]   ;;  %v1432_v51 = vld [vmem:[#allocation10 + $0x28] sm:$0xff]   ;;  %v1434_v53 = vld [vmem:[#allocation10 + $0x18] sm:$0xff]  }
 0x1ee   :  { %v362_v55 = vpop.f32.mrf.mxu0  ;;  %v1290_v56 = vpop.f32.mrf.mxu1  ;;  %v1433_v52 = vld [vmem:[#allocation10 + $0x20] sm:$0xff]  }
 0x1ef   :  { %v1436_v55 = vld [vmem:[#allocation10 + $0x8] sm:$0xff]   ;;  %v1179_v56 = vld [vmem:[%s1810_s4] ss:$0 sm:$0xff] }
 0x1f0   :  { %v1284_v57 = vpop.f32.mrf.mxu0  ;;  %v503_v58 = vpop.f32.mrf.mxu1 }
 0x1f2   :  { %v463_v59 = vpop.f32.mrf.mxu0  ;;  %v505_v60 = vpop.f32.mrf.mxu1 }
 0x1f3   :  { %v504_v61 = vadd.f32 %v503_v58, %v463_v59 }
 0x1f4   :  { %v465_v62 = vpop.f32.mrf.mxu0  ;;  %v506_v63 = vpop.f32.mrf.mxu1 }
 0x1f5   :  { %v509_v0 = vmul.f32 0.00390625, %v504_v61  ;;  %v1437_v63 = vld [vmem:[#allocation10] sm:$0xff]  }
 0x1f6   :  { %v466_v1 = vpop.f32.mrf.mxu0  ;;  %v507_v2 = vpop.f32.mrf.mxu1 }
 0x1f7   :  { %v510_v3 = vpack.c.bf16 %v509_v0, %v509_v0  ;;  %v1438_v0 = vld [vmem:[#allocation11 + $0x38] sm:$0xff]   ;;  %v1439_v1 = vld [vmem:[#allocation11 + $0x30] sm:$0xff]   ;;  %v1440_v2 = vld [vmem:[#allocation11 + $0x28] sm:$0xff]  }
 0x1f8   :  { %v467_v4 = vpop.f32.mrf.mxu0 }
 0x1f9   :  { %v512_v5 = vshrl.u32 %v510_v3, 16  ;;  %1300 = vmatmul.mubr.msk.bf16.vlgmr.msra.gmra.mxu1 %vm222_vm2, %v510_v3  ;;  %v600_v8 = vrot.slane %v510_v3, 1  ;;  %v1441_v3 = vld [vmem:[#allocation11 + $0x20] sm:$0xff]   ;;  %v1442_v4 = vld [vmem:[#allocation11 + $0x18] sm:$0xff]  }
 0x1fa   :  { %1310 = vmatpush3.bf16.msra.mxu1 %v1712_v28  ;;  %1311 = vmatprep.mubr.msk.bf16.mxu1 %vm1609_vm1, %v1608_v9 }
 0x1fb   :  { %1294 = vmatmul.mubr.msk.bf16.vlgmr.msra.gmra.mxu0 %vm222_vm2, %v512_v5  ;;  %1335 = vmatprep.subr.bf16.mxu1 %v1608_v9  ;;  %v645_v6 = vrot.slane %v512_v5, 1  ;;  %v1443_v5 = vld [vmem:[#allocation11 + $0x10] sm:$0xff]  }
 0x1fc   :  { %1304 = vmatpush3.bf16.msra.mxu0 %v1716_v33  ;;  %1305 = vmatprep.mubr.msk.bf16.mxu0 %vm1609_vm1, %v1608_v9 }
 0x1fd   :  { %1315 = vmatprep.subr.bf16.mxu0 %v1608_v9 }
 0x201   :  { %1312 = vmatmul.mubr.msk.bf16.vlgmr.msra.gmra.mxu1 %vm222_vm2, %v645_v6  ;;  %v1444_v6 = vld [vmem:[#allocation11 + $0x8] sm:$0xff]  }
 0x202   :  { %1351 = vmatprep.mubr.msk.bf16.mxu1 %vm1609_vm1, %v1608_v9  ;;  %1336 = vmatpush3.bf16.msra.mxu1 %v1422_v17 }
 0x203   :  { %1306 = vmatmul.mubr.msk.bf16.vlgmr.msra.gmra.mxu0 %vm222_vm2, %v600_v8  ;;  %1337 = vmatprep.subr.bf16.mxu1 %v1608_v9 }
 0x204   :  { %1316 = vmatpush3.bf16.msra.mxu0 %v1414_v7  ;;  %1331 = vmatprep.mubr.msk.bf16.mxu0 %vm1609_vm1, %v1608_v9  ;;  %v1188_v7 = vld [vmem:[%s1812_s6] ss:$0 sm:$0xff] }
 0x205   :  { %1317 = vmatprep.subr.bf16.mxu0 %v1608_v9 }
 0x206   :  { %1338 = vmatpush3.bf16.msra.mxu1 %v1423_v18 }
 0x207   :  { %1339 = vmatprep.subr.bf16.mxu1 %v1608_v9 }
 0x208   :  { %1318 = vmatpush3.bf16.msra.mxu0 %v1415_v10 }
 0x209   :  { %1319 = vmatprep.subr.bf16.mxu0 %v1608_v9 }
 0x20a   :  { %1340 = vmatpush3.bf16.msra.mxu1 %v1424_v19 }
 0x20b   :  { %1341 = vmatprep.subr.bf16.mxu1 %v1608_v9 }
 0x20c   :  { %1320 = vmatpush3.bf16.msra.mxu0 %v1416_v11 }
 0x20d   :  { %1321 = vmatprep.subr.bf16.mxu0 %v1608_v9 }
 0x20e   :  { %1342 = vmatpush3.bf16.msra.mxu1 %v1425_v20 }
 0x20f   :  { %1343 = vmatprep.subr.bf16.mxu1 %v1608_v9 }
 0x210   :  { %1322 = vmatpush3.bf16.msra.mxu0 %v1417_v12 }
 0x211   :  { %1323 = vmatprep.subr.bf16.mxu0 %v1608_v9 }
 0x212   :  { %1344 = vmatpush3.bf16.msra.mxu1 %v1426_v21 }
 0x213   :  { %1345 = vmatprep.subr.bf16.mxu1 %v1608_v9 }
 0x214   :  { %1324 = vmatpush3.bf16.msra.mxu0 %v1418_v13 }
 0x215   :  { %1325 = vmatprep.subr.bf16.mxu0 %v1608_v9 }
 0x216   :  { %1346 = vmatpush3.bf16.msra.mxu1 %v1427_v22  ;;  %v1206_v22 = vld [vmem:[%s1816_s10] ss:$0 sm:$0xff] }
 0x217   :  { %1347 = vmatprep.subr.bf16.mxu1 %v1608_v9 }
 0x218   :  { %1326 = vmatpush3.bf16.msra.mxu0 %v1419_v14 }
 0x219   :  { %1327 = vmatprep.subr.bf16.mxu0 %v1608_v9 }
 0x21a   :  { %1348 = vmatpush3.bf16.msra.mxu1 %v1428_v23 }
 0x21b   :  { %1349 = vmatprep.subr.bf16.mxu1 %v1608_v9 }
 0x21c   :  { %1328 = vmatpush3.bf16.msra.mxu0 %v1420_v15  ;;  %v1445_v15 = vld [vmem:[#allocation11] sm:$0xff]  }
 0x21d   :  { %1329 = vmatprep.subr.bf16.mxu0 %v1608_v9 }
 0x21e   :  { %1350 = vmatpush3.bf16.msra.mxu1 %v1429_v48 }
 0x21f   :  { %1375 = vmatprep.subr.bf16.mxu1 %v1608_v9 }
 0x220   :  { %1330 = vmatpush3.bf16.msra.mxu0 %v1421_v16  ;;  %v1197_v16 = vld [vmem:[%s1814_s8] ss:$0 sm:$0xff]  ;;  %s1566_s8 = scalar_lea.vmem %s1159_s16, 32 }
 0x221   :  { %1355 = vmatprep.subr.bf16.mxu0 %v1608_v9  ;;  %p1567_p2 = scmp.ne.s32.totalorder %s1159_s16, %s1566_s8  ;;  %p1572_p4 = scmp.lt.s32.totalorder %s1566_s8, %s1566_s8 }
 0x223   :  { %p1573_p5 = por %p1572_p4, %p1571_p3 }
 0x225   :  { %p1574_p6 = pnand %p1573_p5, %p1567_p2 }
 0x2b9   :  { %v593_v24 = vpop.f32.mrf.mxu1 }
 0x2bb   :  { %v551_v25 = vpop.f32.mrf.mxu0  ;;  %v1301_v26 = vpop.f32.mrf.mxu1 }
 0x2bc   :  { %v594_v33 = vadd.f32 %v593_v24, %v551_v25 }
 0x2bd   :  { %v1295_v27 = vpop.f32.mrf.mxu0  ;;  %v596_v28 = vpop.f32.mrf.mxu1 }
 0x2bf   :  { %v554_v29 = vpop.f32.mrf.mxu0  ;;  %v1302_v30 = vpop.f32.mrf.mxu1 }
 0x2c1   :  { %v1296_v31 = vpop.f32.mrf.mxu0  ;;  %v683_v32 = vpop.f32.mrf.mxu1 }
 0x2c3   :  { %v638_v34 = vpop.f32.mrf.mxu0  ;;  %v1313_v35 = vpop.f32.mrf.mxu1 }
 0x2c4   :  { %v644_v36 = vadd.f32 %v638_v34, %v594_v33 }
 0x2c5   :  { %v1307_v37 = vpop.f32.mrf.mxu0  ;;  %v686_v38 = vpop.f32.mrf.mxu1 }
 0x2c6   :  { %v689_v39 = vadd.f32 %v683_v32, %v644_v36 }
 0x2c7   :  { %v641_v40 = vpop.f32.mrf.mxu0  ;;  %v1314_v41 = vpop.f32.mrf.mxu1 }
 0x2c8   :  { %v691_v42 = vrot.slane %v689_v39, 7 }
 0x2c9   :  { %v1308_v44 = vpop.f32.mrf.mxu0 }
 0x2ca   :  { %v694_v45 = vsel %vm693_vm3, %v1735_v54, %v691_v42  ;;  %v1435_v54 = vld [vmem:[#allocation10 + $0x10] sm:$0xff]  }
 0x2cb   :  { %v702_v46 = vadd.f32 %v1178_v43, %v694_v45 }
 0x2cd   :  { %v703_v47 = vpack.c.bf16 %v702_v46, %v702_v46 }
 0x2cf   :  { %1332 = vmatmul.mubr.bf16.vlgmr.msra.gmra.mxu0 %v703_v47 }
 0x2d0   :  { %1371 = vmatprep.mubr.msk.bf16.mxu0 %vm1609_vm1, %v1608_v9  ;;  %1356 = vmatpush3.bf16.msra.mxu0 %v1430_v49 }
 0x2d1   :  { %1357 = vmatprep.subr.bf16.mxu0 %v1608_v9 }
 0x2d4   :  { %1358 = vmatpush3.bf16.msra.mxu0 %v1431_v50 }
 0x2d5   :  { %1359 = vmatprep.subr.bf16.mxu0 %v1608_v9 }
 0x2d8   :  { %1360 = vmatpush3.bf16.msra.mxu0 %v1432_v51 }
 0x2d9   :  { %1361 = vmatprep.subr.bf16.mxu0 %v1608_v9 }
 0x2dc   :  { %1362 = vmatpush3.bf16.msra.mxu0 %v1433_v52 }
 0x2dd   :  { %1363 = vmatprep.subr.bf16.mxu0 %v1608_v9 }
 0x2e0   :  { %1364 = vmatpush3.bf16.msra.mxu0 %v1434_v53 }
 0x2e1   :  { %1365 = vmatprep.subr.bf16.mxu0 %v1608_v9 }
 0x2e4   :  { %1366 = vmatpush3.bf16.msra.mxu0 %v1435_v54 }
 0x2e5   :  { %1367 = vmatprep.subr.bf16.mxu0 %v1608_v9 }
 0x2e8   :  { %1368 = vmatpush3.bf16.msra.mxu0 %v1436_v55 }
 0x2e9   :  { %1369 = vmatprep.subr.bf16.mxu0 %v1608_v9 }
 0x2ec   :  { %1370 = vmatpush3.bf16.msra.mxu0 %v1437_v63 }
 0x38f   :  { %v809_v57 = vpop.f32.mrf.mxu0 }
 0x390   :  { %v810_v58 = vadd.f32 %v1179_v56, %v809_v57 }
 0x391   :  { %v1333_v59 = vpop.f32.mrf.mxu0 }
 0x392   :  { %v815_v60 = vpack.c.bf16 %v810_v58, %v810_v58 }
 0x393   :  { %v812_v61 = vpop.f32.mrf.mxu0 }
 0x394   :  { %1352 = vmatmul.mubr.bf16.vlgmr.msra.gmra.mxu1 %v815_v60 }
 0x395   :  { %v1334_v62 = vpop.f32.mrf.mxu0  ;;  %1391 = vmatprep.mubr.msk.bf16.mxu1 %vm1609_vm1, %v1608_v9  ;;  %1376 = vmatpush3.bf16.msra.mxu1 %v1438_v0 }
 0x396   :  { %1377 = vmatprep.subr.bf16.mxu1 %v1608_v9 }
 0x399   :  { %1378 = vmatpush3.bf16.msra.mxu1 %v1439_v1 }
 0x39a   :  { %1379 = vmatprep.subr.bf16.mxu1 %v1608_v9 }
 0x39d   :  { %1380 = vmatpush3.bf16.msra.mxu1 %v1440_v2 }
 0x39e   :  { %1381 = vmatprep.subr.bf16.mxu1 %v1608_v9 }
 0x3a1   :  { %1382 = vmatpush3.bf16.msra.mxu1 %v1441_v3 }
 0x3a2   :  { %1383 = vmatprep.subr.bf16.mxu1 %v1608_v9 }
 0x3a5   :  { %1384 = vmatpush3.bf16.msra.mxu1 %v1442_v4 }
 0x3a6   :  { %1385 = vmatprep.subr.bf16.mxu1 %v1608_v9 }
 0x3a9   :  { %1386 = vmatpush3.bf16.msra.mxu1 %v1443_v5 }
 0x3aa   :  { %1387 = vmatprep.subr.bf16.mxu1 %v1608_v9 }
 0x3ad   :  { %1388 = vmatpush3.bf16.msra.mxu1 %v1444_v6 }
 0x3ae   :  { %1389 = vmatprep.subr.bf16.mxu1 %v1608_v9 }
 0x3b1   :  { %1390 = vmatpush3.bf16.msra.mxu1 %v1445_v15 }
 0x454   :  { %v921_v8 = vpop.f32.mrf.mxu1 }
 0x455   :  { %v922_v10 = vadd.f32 %v1188_v7, %v921_v8 }
 0x456   :  { %v1353_v11 = vpop.f32.mrf.mxu1 }
 0x457   :  { %v927_v12 = vpack.c.bf16 %v922_v10, %v922_v10 }
 0x458   :  { %v924_v13 = vpop.f32.mrf.mxu1 }
 0x459   :  { %1372 = vmatmul.mubr.bf16.vlgmr.msra.gmra.mxu0 %v927_v12 }
 0x45a   :  { %v1354_v14 = vpop.f32.mrf.mxu1 }
 0x519   :  { %v1033_v17 = vpop.f32.mrf.mxu0 }
 0x51a   :  { %v1034_v18 = vadd.f32 %v1197_v16, %v1033_v17 }
 0x51b   :  { %v1373_v9 = vpop.f32.mrf.mxu0 }
 0x51c   :  { %v1039_v19 = vpack.c.bf16 %v1034_v18, %v1034_v18 }
 0x51d   :  { %v1036_v20 = vpop.f32.mrf.mxu0 }
 0x51e   :  { %1392 = vmatmul.mubr.bf16.vlgmr.msra.gmra.mxu1 %v1039_v19 }
 0x51f   :  { %v1374_v21 = vpop.f32.mrf.mxu0 }
 0x5de   :  { %v1145_v23 = vpop.f32.mrf.mxu1 }
 0x5df   :  { %v1146_v24 = vadd.f32 %v1206_v22, %v1145_v23 }
 0x5e0   :  { %v1393_v25 = vpop.f32.mrf.mxu1 }
 0x5e1   :  { %1151 = vst [vmem:[#allocation13] sm:$0x3] %v1146_v24 }
 0x5e2   :  { %v1148_v26 = vpop.f32.mrf.mxu1 }
 0x5e3   :  { %1577 = shalt.err (!%p1574_p6)
}
 0x5e4   :  { %1161 = dma.vmem_to_hbm [thread:$0]  %s1159_s16, 32, %s1817_s11, [#allocation4]   ;;  %v1394_v27 = vpop.f32.mrf.mxu1 }
 0x5e5   :  { %1594 = dma.done.wait [#allocation4], 32  }
 0x5e6   :  { %1595 = vsyncadd [#allocation4], 4294967264 }
 0x5e7   :  { %1165 = vsyncpa [#allocation3], 1 }
 0x5e8   :  { %1166 = vsyncpa [#allocation6], 1 }
 0x5e9   :  { %1167 = vsyncpa [#allocation9], 1 }
 0x5ea   :  { %1168 = vsyncpa [#allocation12], 1 }
 0x5eb   :  { %1169 = vsyncpa [#allocation4], 1 }

</bundles_post_ra>
